<compile_context>
chip_gen: v7x
topology: tpu7x:2x2x1
jax: 0.10.0
libtpu: 0.0.40
codegen_flags: <defaults>
</compile_context>

<pallas_src>
import functools

import jax
import jax.numpy as jnp
from jax.experimental import pallas as pl
from jax.experimental.pallas import tpu as pltpu


def _cdiv(a, b):
    return -(-a // b)


def _round_up(x, m):
    return _cdiv(x, m) * m


def _vmem_capacity_bytes():
    try:
        return int(pltpu.get_tpu_info().vmem_capacity_bytes)
    except Exception:
        return 64 << 20            # conservative (v7x-sized) fallback


# ----------------------------- Pallas hot path ----------------------------- #

def _conv_stacked_kernel(x_ref, w_hbm, b_ref, o_ref, w_vmem, load_sem, *opt_scratch,
                         kt, ck, m_comp, mode, apply_act, negative_slope):
    """One chunk of stacked planes: (rows_blk, ck) -> (rows_blk, cout).

    x_ref  : (rows_blk, ck)   stacked, zero-padded planes (pipelined per chunk)
    w_hbm  : folded weight left in HBM (memory_space=pl.ANY), DMA'd once
    b_ref  : (1, cout)        bias (f32)
    o_ref  : (rows_blk, cout)
    w_vmem : VMEM scratch holding the single-buffered folded weight
    opt_scratch[0] (mode=="mxu"): (m_comp, kt*ck) in-VMEM im2col scratch
    """
    # One-time weight DMA into the single-buffered VMEM scratch.  The grid axis is
    # "arbitrary" (sequential on one TensorCore), so step 0 always runs first and the
    # scratch persists across the remaining grid steps.
    @pl.when(pl.program_id(0) == 0)
    def _():
        cp = pltpu.make_async_copy(w_hbm, w_vmem, load_sem)
        cp.start()
        cp.wait()

    cout = o_ref.shape[-1]

    if mode == "mxu":
        cat_ref = opt_scratch[0]
        # im2col in VMEM: kt shifted row views side by side, then ONE fat-K MXU matmul
        # (no per-tap read-modify-write of a (M, cout) f32 accumulator).
        for t in range(kt):
            cat_ref[pl.ds(0, m_comp), pl.ds(t * ck, ck)] = x_ref[pl.ds(t, m_comp), :]
        acc = jnp.dot(cat_ref[...], w_vmem[...], preferred_element_type=jnp.float32)
    elif mode == "vpu":
        # Layer 1: total contraction depth kt*ck <= 8 -> broadcast FMAs, skip the MXU.
        wv = w_vmem[...].astype(jnp.float32)                 # (kt*ck, cout), tiny
        acc = jnp.zeros((m_comp, cout), jnp.float32)
        for t in range(kt):
            rows = x_ref[pl.ds(t, m_comp), :].astype(jnp.float32)
            for c in range(ck):
                r = t * ck + c
                acc = acc + rows[:, c:c + 1] * wv[r:r + 1, :]
    else:  # "reduce": last layer, cout == 1 -> VPU FMA + one lane reduction.
        accw = jnp.zeros((m_comp, ck), jnp.float32)
        for t in range(kt):
            rows = x_ref[pl.ds(t, m_comp), :].astype(jnp.float32)
            accw = accw + rows * w_vmem[pl.ds(t, 1), :].astype(jnp.float32)
        acc = jnp.sum(accw, axis=-1, keepdims=True)

    # Epilogue always in f32 (v5e VPU has no bf16); cast once at the store.
    acc = acc + b_ref[...].astype(jnp.float32)
    if apply_act:
        acc = jnp.where(acc >= 0.0, acc, acc * negative_slope)
    o_ref[pl.ds(0, m_comp), :] = acc.astype(o_ref.dtype)
    if kt > 1:
        # The last kt-1 rows of the chunk would need the next chunk's halo; they are
        # garbage rows by construction (never read back) -- write zeros to keep the
        # output buffer fully defined.
        o_ref[pl.ds(m_comp, kt - 1), :] = jnp.zeros((kt - 1, cout), o_ref.dtype)


def _conv_layer_pallas(x2d, w2d, bias2d, out_dtype, *, rows_blk, m_comp, kt, ck,
                       mode, apply_act, negative_slope, vmem_limit):
    total_rows = x2d.shape[0]
    cout = bias2d.shape[-1]
    n_chunks = _cdiv(total_rows, rows_blk)
    kernel = functools.partial(
        _conv_stacked_kernel, kt=kt, ck=ck, m_comp=m_comp, mode=mode,
        apply_act=apply_act, negative_slope=negative_slope)
    scratch = [pltpu.VMEM(w2d.shape, w2d.dtype),          # single-buffered folded weight
               pltpu.SemaphoreType.DMA(())]
    if mode == "mxu":
        scratch.append(pltpu.VMEM((m_comp, kt * ck), x2d.dtype))   # in-VMEM im2col
    return pl.pallas_call(
        kernel,
        out_shape=jax.ShapeDtypeStruct((total_rows, cout), out_dtype),
        grid=(n_chunks,),
        in_specs=[
            pl.BlockSpec((rows_blk, ck), lambda i: (i, 0)),   # activation chunk (pipelined)
            pl.BlockSpec(memory_space=pl.ANY),                # weight stays in HBM; DMA once
            pl.BlockSpec((1, cout), lambda i: (0, 0)),        # bias
        ],
        out_specs=pl.BlockSpec((rows_blk, cout), lambda i: (i, 0)),
        scratch_shapes=scratch,
        compiler_params=pltpu.CompilerParams(
            # Sequential grid: required for the one-time weight load at step 0.
            # TODO(synk): pltpu.CORE_PARALLEL plane split on v7x (needs per-core init).
            dimension_semantics=("arbitrary",),
            vmem_limit_bytes=vmem_limit,
        ),
    )(x2d, w2d, bias2d)


# ------------------------------- model ------------------------------------- #

class PeriodDiscriminatorPallas:
    """Mirrors hw_nv.model.MPD.PeriodDiscriminator.forward semantics."""

    def __init__(self, period, leaky_relu=0.1, key=None, compute_dtype=None,
                 max_planes_per_chunk=None, act_budget_bytes=12 << 20):
        self.period = period
        self.leaky_relu = leaky_relu
        # bf16 storage + f32 accumulate is the recommended default on v6e/v7x; pass
        # jnp.float32 for exact parity with an f32 reference.
        self.compute_dtype = jnp.bfloat16 if compute_dtype is None else compute_dtype
        self.max_planes_per_chunk = max_planes_per_chunk
        self._act_budget = int(act_budget_bytes)
        vmem_phys = _vmem_capacity_bytes()
        # ~96 MiB cap on 128 MiB parts (v5e/v6e), ~48 MiB on 64 MiB parts (v7x).
        self._vmem_cap = (96 << 20) if vmem_phys >= (128 << 20) else (48 << 20)
        if key is None:
            key = jax.random.PRNGKey(0)

        # (C_in, C_out, kh, stride, pad) -- kernel width is always 1, width pad 0.
        specs = []
        last = 1
        for l in range(1, 5):
            specs.append((last, 2 ** (5 + l), 5, 3, 2))
            last = 2 ** (5 + l)
        specs.append((last, 1024, 5, 1, 2))
        specs.append((1024, 1, 3, 1, 1))
        self.specs = specs
        n_layers = len(specs)

        # Deterministic synthetic weights (weight_norm at init == underlying conv weight).
        self.params = []   # raw OIHW f32 weights, used by the pure-JAX reference
        self.layers = []   # per-layer folded / pre-laid-out kernel operands
        for i, (cin, cout, kh, s, p) in enumerate(specs):
            key, kw, kb = jax.random.split(key, 3)
            std = (2.0 / (cin * kh)) ** 0.5
            w = jax.random.normal(kw, (cout, cin, kh, 1), jnp.float32) * std   # OIHW
            b = jax.random.normal(kb, (cout,), jnp.float32) * 0.01
            self.params.append((w, b))

            # Space-to-depth folding: kt = ceil(kh/s) taps over rows of width ck = s*cin,
            # flattened to a single (kt*ck, cout) fat-K matrix for the MXU path.
            kt = _cdiv(kh, s)
            ck = s * cin
            w_hw = jnp.transpose(w[:, :, :, 0], (2, 1, 0))               # (kh, cin, cout)
            w_hw = jnp.pad(w_hw, ((0, kt * s - kh), (0, 0), (0, 0)))     # zero extra taps
            w_sd = w_hw.reshape(kt, ck, cout)                            # (kt, s*cin, cout)

            if cout == 1:
                mode = "reduce"
                w_k = w_sd[:, :, 0]                                      # (kt, ck)
            elif kt * ck <= 8:
                mode = "vpu"
                w_k = w_sd.reshape(kt * ck, cout)
            else:
                mode = "mxu"
                w_k = w_sd.reshape(kt * ck, cout)                        # fat-K folded weight
            self.layers.append(dict(
                cin=cin, cout=cout, kh=kh, stride=s, pad=p, kt=kt, ck=ck,
                mode=mode, apply_act=(i + 1 != n_layers),
                w=w_k.astype(self.compute_dtype),
                b=b.reshape(1, cout).astype(jnp.float32),
            ))

    # ----------------------------- sizing --------------------------------- #

    def _plane_bytes(self, R_pad, ck, cout, kt, mode):
        """VMEM bytes per plane in a chunk, padded to the (8,128) vreg tiling."""
        itm = jnp.dtype(self.compute_dtype).itemsize
        ck_l = _round_up(ck, 128)
        co_l = _round_up(cout, 128)
        per = 2 * R_pad * (ck_l + co_l) * itm          # double-buffered in/out blocks
        per += R_pad * co_l * 4                        # f32 epilogue value
        if mode == "mxu":
            per += R_pad * _round_up(kt * ck, 128) * itm   # in-VMEM im2col scratch
        if mode == "reduce":
            per += R_pad * ck_l * 4                    # f32 pre-reduction value
        return per

    def _choose_bpc(self, Bp, R_pad, ck, cout, kt, mode):
        if self.max_planes_per_chunk is not None:
            return max(1, min(int(self.max_planes_per_chunk), Bp))
        per = self._plane_bytes(R_pad, ck, cout, kt, mode)
        return int(max(1, min(Bp, self._act_budget // max(per, 1))))

    def _vmem_limit(self, bpc, R_pad, ck, cout, kt, mode, w_shape):
        itm = jnp.dtype(self.compute_dtype).itemsize
        w_bytes = _round_up(w_shape[0], 8) * _round_up(w_shape[1], 128) * itm
        est = bpc * self._plane_bytes(R_pad, ck, cout, kt, mode) + w_bytes + (2 << 20)
        return int(min(self._vmem_cap, max(32 << 20, 2 * est)))

    # ------------------------------ layers -------------------------------- #

    def _run_layer(self, cur, layer):
        Bp, H, C = cur.shape
        s, kh, p = layer["stride"], layer["kh"], layer["pad"]
        kt, ck, cout, mode = layer["kt"], layer["ck"], layer["cout"], layer["mode"]
        assert C == layer["cin"]
        H_out = (H + 2 * p - kh) // s + 1
        assert H_out >= 1, "input too short for this layer"

        # Plane row pitch in the folded (space-to-depth) domain: enough rows for every
        # tap of the last valid output row, rounded up to the sublane tile (8).  Each
        # plane carries its own conv zero-padding, so stacked planes never need a halo.
        R_pad = _round_up(H_out + kt - 1, 8)
        pad_bot = R_pad * s - H - p
        assert pad_bot >= 0
        x_pad = jnp.pad(cur, ((0, 0), (p, pad_bot), (0, 0)))
        # Row-major-compatible space-to-depth fold + plane stacking (one fused XLA copy,
        # replacing the old pad + take-gather + slice round trips).
        x2d = x_pad.reshape(Bp * R_pad, ck)

        bpc = self._choose_bpc(Bp, R_pad, ck, cout, kt, mode)
        rows_blk = bpc * R_pad
        m_comp = rows_blk - (kt - 1)
        out2d = _conv_layer_pallas(
            x2d, layer["w"], layer["b"], self.compute_dtype,
            rows_blk=rows_blk, m_comp=m_comp, kt=kt, ck=ck, mode=mode,
            apply_act=layer["apply_act"], negative_slope=self.leaky_relu,
            vmem_limit=self._vmem_limit(bpc, R_pad, ck, cout, kt, mode, layer["w"].shape))
        return out2d.reshape(Bp, R_pad, cout), H_out

    # ------------------------------ forward ------------------------------- #

    def __call__(self, x):
        # x: (bs, channels, time) -- channels == 1 as in the PyTorch module.
        bs, ch, time = x.shape
        if time % self.period != 0:
            n_pad = self.period - time % self.period
            x = jnp.pad(x, ((0, 0), (0, 0), (0, n_pad)), mode="reflect")
            time = x.shape[-1]
        H, W = time // self.period, self.period
        x = x.reshape(bs, ch, H, W)                                    # NCHW view

        # Stay channel-last (B*W, H, C) through the whole conv stack; NCHW feature views
        # are materialized once at the end.
        cur = jnp.transpose(x, (0, 3, 2, 1)).reshape(bs * W, H, ch)
        cur = cur.astype(self.compute_dtype)

        feats_cl = []
        for layer in self.layers:
            out_full, H_out = self._run_layer(cur, layer)              # (Bp, R_pad, cout)
            cur = out_full[:, :H_out, :]                               # valid rows only
            feats_cl.append(cur)

        features = []
        for layer, f in zip(self.layers, feats_cl):
            Hf, Cf = f.shape[1], layer["cout"]
            features.append(jnp.transpose(f.reshape(bs, W, Hf, Cf), (0, 3, 2, 1)))
        out = features[-1].reshape(bs, -1)                             # flatten(start_dim=1)
        return out, features


# ------------------------- pure-JAX reference check ------------------------ #

def reference_forward(model, x):
    bs, ch, time = x.shape
    if time % model.period != 0:
        n_pad = model.period - time % model.period
        x = jnp.pad(x, ((0, 0), (0, 0), (0, n_pad)), mode="reflect")
        time = x.shape[-1]
    x = x.reshape(bs, ch, time // model.period, model.period)
    feats = []
    n = len(model.specs)
    for i, ((_cin, _cout, _kh, s, p), (w, b)) in enumerate(zip(model.specs, model.params)):
        x = jax.lax.conv_general_dilated(
            x, w, window_strides=(s, 1), padding=((p, p), (0, 0)),
            dimension_numbers=("NCHW", "OIHW", "NCHW"),
        )
        x = x + b[None, :, None, None]
        if i + 1 != n:
            x = jnp.where(x >= 0, x, x * model.leaky_relu)
        feats.append(x)
    return x.reshape(bs, -1), feats


if __name__ == "__main__":
    key = jax.random.PRNGKey(0)
    kx, kp = jax.random.split(key)

    bs, ch, time, period = 2, 1, 190, 3   # 190 % 3 != 0 -> exercises the reflect-pad path
    x = jax.random.normal(kx, (bs, ch, time), jnp.float32)

    # f32 model with small plane chunks so the multi-chunk pipelined path is exercised.
    model = PeriodDiscriminatorPallas(period=period, leaky_relu=0.1, key=kp,
                                      compute_dtype=jnp.float32, max_planes_per_chunk=2)
    out, feats = model(x)
    out = jax.block_until_ready(out)

    ref_out, ref_feats = reference_forward(model, x)
    # NOTE(review): both implementations run their f32 contractions at the TPU's default
    # matmul precision, so the cross-implementation tolerance cannot be arbitrarily tight.
    ok = out.shape == ref_out.shape and bool(
        jnp.allclose(out, ref_out, rtol=5e-2, atol=1e-3)
    )
    for f, rf in zip(feats, ref_feats):
        ok = ok and (f.shape == rf.shape) and bool(
            jnp.allclose(f, rf, rtol=5e-2, atol=1e-3)
        )

    # bf16 storage / f32 accumulate path (v6e/v7x default) with auto chunk sizing,
    # checked against the f32 kernel path with a norm-relative tolerance (not just isfinite).
    model_bf16 = PeriodDiscriminatorPallas(period=period, leaky_relu=0.1, key=kp)
    out16, feats16 = model_bf16(x)
    out16 = jax.block_until_ready(out16)
    ok = ok and (out16.shape == ref_out.shape)
    ok = ok and bool(jnp.all(jnp.isfinite(out16.astype(jnp.float32))))
    f32_deep = feats[-2].astype(jnp.float32)
    bf16_deep = feats16[-2].astype(jnp.float32)
    rel = jnp.linalg.norm(bf16_deep - f32_deep) / (jnp.linalg.norm(f32_deep) + 1e-6)
    ok = ok and bool(rel < 0.1)

    if ok:
        print("KERNEL_OK")
    else:
        raise SystemExit("Pallas output mismatch vs JAX reference")
</pallas_src>

<mosaic_0001>
module attributes {stable_mosaic.version = 11 : i64} {
  func.func @_conv_stacked_kernel(%arg0: i32, %arg1: memref<48x3xf32, #tpu.memory_space<vmem>>, %arg2: memref<6x64xf32, #tpu.memory_space<any>>, %arg3: memref<1x64xf32, #tpu.memory_space<vmem>>, %arg4: memref<48x64xf32, #tpu.memory_space<vmem>>, %arg5: memref<6x64xf32, #tpu.memory_space<vmem>>, %arg6: memref<!tpu.dma_semaphore, #tpu.memory_space<semaphore_mem>>) attributes {dimension_semantics = [#tpu.dimension_semantics<arbitrary>], iteration_bounds = array<i64: 3>, scalar_prefetch = 0 : i64, scratch_operands = 2 : i64, tpu.core_type = #tpu.core_type<tc>, window_params = [{transform_indices = @transform_0, window_bounds = array<i64: 48, 3>}, {}, {pipeline_mode = #tpu.pipeline_mode<synchronous>, transform_indices = @transform_2, window_bounds = array<i64: 1, 64>}, {transform_indices = @transform_3, window_bounds = array<i64: 48, 64>}]} {
    %c0_i32 = arith.constant 0 : i32
    %0 = arith.cmpi eq, %arg0, %c0_i32 : i32
    %1 = arith.extui %0 : i1 to i32
    %c0_i32_0 = arith.constant 0 : i32
    %2 = arith.cmpi ne, %1, %c0_i32_0 : i32
    scf.if %2 {
      tpu.enqueue_dma source(%arg2 : memref<6x64xf32, #tpu.memory_space<any>>) target(%arg5 : memref<6x64xf32, #tpu.memory_space<vmem>>) target_semaphore(%arg6 : memref<!tpu.dma_semaphore, #tpu.memory_space<semaphore_mem>>)
      tpu.wait_dma2 semaphore(%arg6 : memref<!tpu.dma_semaphore, #tpu.memory_space<semaphore_mem>>) src(%arg2 : memref<6x64xf32, #tpu.memory_space<any>>) dst(%arg5 : memref<6x64xf32, #tpu.memory_space<vmem>>)
    } else {
    }
    %c0 = arith.constant 0 : index
    %c0_1 = arith.constant 0 : index
    %3 = vector.load %arg5[%c0, %c0_1] : memref<6x64xf32, #tpu.memory_space<vmem>>, vector<6x64xf32>
    %cst = arith.constant 0.000000e+00 : f32
    %4 = vector.broadcast %cst : f32 to vector<47x64xf32>
    %c0_2 = arith.constant 0 : index
    %c0_3 = arith.constant 0 : index
    %5 = vector.load %arg1[%c0_2, %c0_3] : memref<48x3xf32, #tpu.memory_space<vmem>>, vector<47x3xf32>
    %6 = vector.extract_strided_slice %5 {offsets = [0, 0], sizes = [47, 1], strides = [1, 1]} : vector<47x3xf32> to vector<47x1xf32>
    %7 = vector.extract_strided_slice %3 {offsets = [0, 0], sizes = [1, 64], strides = [1, 1]} : vector<6x64xf32> to vector<1x64xf32>
    %8 = vector.broadcast %6 : vector<47x1xf32> to vector<47x64xf32>
    %9 = vector.broadcast %7 : vector<1x64xf32> to vector<47x64xf32>
    %10 = arith.mulf %8, %9 : vector<47x64xf32>
    %11 = arith.addf %4, %10 : vector<47x64xf32>
    %12 = vector.extract_strided_slice %5 {offsets = [0, 1], sizes = [47, 1], strides = [1, 1]} : vector<47x3xf32> to vector<47x1xf32>
    %13 = vector.extract_strided_slice %3 {offsets = [1, 0], sizes = [1, 64], strides = [1, 1]} : vector<6x64xf32> to vector<1x64xf32>
    %14 = vector.broadcast %12 : vector<47x1xf32> to vector<47x64xf32>
    %15 = vector.broadcast %13 : vector<1x64xf32> to vector<47x64xf32>
    %16 = arith.mulf %14, %15 : vector<47x64xf32>
    %17 = arith.addf %11, %16 : vector<47x64xf32>
    %18 = vector.extract_strided_slice %5 {offsets = [0, 2], sizes = [47, 1], strides = [1, 1]} : vector<47x3xf32> to vector<47x1xf32>
    %19 = vector.extract_strided_slice %3 {offsets = [2, 0], sizes = [1, 64], strides = [1, 1]} : vector<6x64xf32> to vector<1x64xf32>
    %20 = vector.broadcast %18 : vector<47x1xf32> to vector<47x64xf32>
    %21 = vector.broadcast %19 : vector<1x64xf32> to vector<47x64xf32>
    %22 = arith.mulf %20, %21 : vector<47x64xf32>
    %23 = arith.addf %17, %22 : vector<47x64xf32>
    %c1 = arith.constant 1 : index
    %c0_4 = arith.constant 0 : index
    %24 = vector.load %arg1[%c1, %c0_4] : memref<48x3xf32, #tpu.memory_space<vmem>>, vector<47x3xf32>
    %25 = vector.extract_strided_slice %24 {offsets = [0, 0], sizes = [47, 1], strides = [1, 1]} : vector<47x3xf32> to vector<47x1xf32>
    %26 = vector.extract_strided_slice %3 {offsets = [3, 0], sizes = [1, 64], strides = [1, 1]} : vector<6x64xf32> to vector<1x64xf32>
    %27 = vector.broadcast %25 : vector<47x1xf32> to vector<47x64xf32>
    %28 = vector.broadcast %26 : vector<1x64xf32> to vector<47x64xf32>
    %29 = arith.mulf %27, %28 : vector<47x64xf32>
    %30 = arith.addf %23, %29 : vector<47x64xf32>
    %31 = vector.extract_strided_slice %24 {offsets = [0, 1], sizes = [47, 1], strides = [1, 1]} : vector<47x3xf32> to vector<47x1xf32>
    %32 = vector.extract_strided_slice %3 {offsets = [4, 0], sizes = [1, 64], strides = [1, 1]} : vector<6x64xf32> to vector<1x64xf32>
    %33 = vector.broadcast %31 : vector<47x1xf32> to vector<47x64xf32>
    %34 = vector.broadcast %32 : vector<1x64xf32> to vector<47x64xf32>
    %35 = arith.mulf %33, %34 : vector<47x64xf32>
    %36 = arith.addf %30, %35 : vector<47x64xf32>
    %37 = vector.extract_strided_slice %24 {offsets = [0, 2], sizes = [47, 1], strides = [1, 1]} : vector<47x3xf32> to vector<47x1xf32>
    %38 = vector.extract_strided_slice %3 {offsets = [5, 0], sizes = [1, 64], strides = [1, 1]} : vector<6x64xf32> to vector<1x64xf32>
    %39 = vector.broadcast %37 : vector<47x1xf32> to vector<47x64xf32>
    %40 = vector.broadcast %38 : vector<1x64xf32> to vector<47x64xf32>
    %41 = arith.mulf %39, %40 : vector<47x64xf32>
    %42 = arith.addf %36, %41 : vector<47x64xf32>
    %c0_5 = arith.constant 0 : index
    %c0_6 = arith.constant 0 : index
    %43 = vector.load %arg3[%c0_5, %c0_6] : memref<1x64xf32, #tpu.memory_space<vmem>>, vector<1x64xf32>
    %44 = vector.broadcast %43 : vector<1x64xf32> to vector<47x64xf32>
    %45 = arith.addf %42, %44 : vector<47x64xf32>
    %cst_7 = arith.constant 0.000000e+00 : f32
    %46 = vector.broadcast %cst_7 : f32 to vector<47x64xf32>
    %47 = arith.cmpf oge, %45, %46 : vector<47x64xf32>
    %cst_8 = arith.constant 1.000000e-01 : f32
    %48 = vector.broadcast %cst_8 : f32 to vector<47x64xf32>
    %49 = arith.mulf %45, %48 : vector<47x64xf32>
    %50 = arith.select %47, %45, %49 : vector<47x64xi1>, vector<47x64xf32>
    %c0_9 = arith.constant 0 : index
    %c0_10 = arith.constant 0 : index
    %51 = vector.load %arg4[%c0_9, %c0_10] : memref<48x64xf32, #tpu.memory_space<vmem>>, vector<47x64xf32>
    tpu.vector_store %arg4[%c0_9, %c0_10], %50 {strides = array<i32>} : memref<48x64xf32, #tpu.memory_space<vmem>>, vector<47x64xf32>,
    %cst_11 = arith.constant 0.000000e+00 : f32
    %52 = vector.broadcast %cst_11 : f32 to vector<1x64xf32>
    %c47 = arith.constant 47 : index
    %c0_12 = arith.constant 0 : index
    %53 = vector.load %arg4[%c47, %c0_12] : memref<48x64xf32, #tpu.memory_space<vmem>>, vector<1x64xf32>
    tpu.vector_store %arg4[%c47, %c0_12], %52 {strides = array<i32>} : memref<48x64xf32, #tpu.memory_space<vmem>>, vector<1x64xf32>,
    return
  }
  func.func @transform_0(%arg0: i32) -> (i32, i32) {
    %c0_i32 = arith.constant 0 : i32
    %c0_i32_0 = arith.constant 0 : i32
    return %arg0, %c0_i32 : i32, i32
  }
  func.func @transform_2(%arg0: i32) -> (i32, i32) {
    %c0_i32 = arith.constant 0 : i32
    %c0_i32_0 = arith.constant 0 : i32
    %c0_i32_1 = arith.constant 0 : i32
    return %c0_i32, %c0_i32_0 : i32, i32
  }
  func.func @transform_3(%arg0: i32) -> (i32, i32) {
    %c0_i32 = arith.constant 0 : i32
    %c0_i32_0 = arith.constant 0 : i32
    return %arg0, %c0_i32 : i32, i32
  }
}

</mosaic_0001>

<bundles_post_ra>
// kernel: tpu_custom_call.1
= control target key start
LH: loop header
LB: loop body
LE: loop exit
PB: predicated region body
PF: predicated region fallthrough
CT: control target
= control target key end

     0   :  { %s644_s12 = smov 0   ;;  %s773_s0 = inlined_call_operand.vmem [shape: f32[144,3], index: 0, kind: input, shape index: {}]   ;;  %s774_s1 = inlined_call_operand.vmem [shape: f32[6,64], index: 1, kind: input, shape index: {}]   ;;  %s775_s2 = inlined_call_operand.vmem [shape: f32[1,64], index: 2, kind: input, shape index: {}]   ;;  %s776_s3 = inlined_call_operand.vmem [shape: f32[144,64], index: 3, kind: output, shape index: {}]  }
   0x1 LB: > { %s577_s13 = sadd.s32 4294967295, %s618_s12   ;;  %p581_p0 = scmp.ge.s32.totalorder %s618_s12, 1  ;;  %s618_s12 = sphi %s644_s12, %s13_s12  }
   0x2   : > { %p114_p1 = scmp.lt.s32.totalorder %s618_s12, 4 }
   0x4   : > { %p115_p2 = pnand %p581_p0, %p114_p1 }
   0x5   : > { %s136_s14 = smul.u32 (!%p115_p2), 6, %s577_s13  ;;  %p584_p4 = scmp.ne.s32.totalorder (!%p115_p2), %s577_s13, 0 }
   0x6   : > { %118 = sbr.rel (%p115_p2) target bundleno = 244 (0xf4), region = 28 }
   0x7   : > { %p137_p3 = scmp.lt.s32.totalorder (!%p115_p2), %s136_s14, 17 }
   0xd   : > { %s778_s14 = smov (!%p137_p3, %s136_s14), 17  ;;  %151 = sbr.rel (%p584_p4) target bundleno = 23 (0x17), region = 32 }
   0xe   : > { %s582_s15 = sshll.u32 %s778_s14, 3  ;;  %v169_v0 = vld [vmem:[%s774_s1] sm:$0x3f] (!%p584_p4) }
   0xf   : > { %s655_s18 = scalar_lea.vmem %s773_s0, %s582_s15  ;;  %s660_s21 = scalar_lea.vmem %s776_s3, %s582_s15  ;;  %170 = vst [vmem:[#allocation2] sm:$0x3f] (!%p584_p4), %v169_v0 }
  0x14   : > { %195 = vsyncadd [#allocation3], 96 }
  0x15   : > { %614 = dma.done.wait [#allocation3], 96 }
  0x16   : > { %615 = vsyncadd [#allocation3], 4294967200 }
  0x17 PF: > { %v202_v1 = vld [vmem:[%s655_s18 + $0x10] sm:$0xff]  ;;  %v200_v2 = vld [vmem:[%s655_s18] sm:$0xff]  ;;  %v620_v3 = vmov 0   ;;  %v203_v4 = vld [vmem:[%s655_s18 + $0x18] sm:$0xff]  ;;  %v621_v9 = vmov 1   ;;  %v622_v12 = vmov 2   ;;  %v236_v33 = vlaneseq }
  0x18   : > { %602 = vset.pattern.permute.xlu1 %v620_v3  ;;  %601 = vset.pattern.permute.xlu0 %v620_v3  ;;  %v201_v5 = vld [vmem:[%s655_s18 + $0x8] sm:$0xff]  ;;  %v204_v7 = vld [vmem:[%s655_s18 + $0x20] sm:$0xff]  ;;  %v334_v15 = vld [vmem:[%s655_s18 + $0x11] sm:$0xff]  ;;  %vm503_vm0 = vcmask 516096   ;;  %v623_v16 = vmov 0.0   ;;  %vm495_vm1 = vcmask 523264  }
  0x19   : > { %218 = vperm.xlu1 %602, %v202_v1   ;;  %208 = vperm.xlu0 %601, %v200_v2   ;;  %v205_v6 = vld [vmem:[%s655_s18 + $0x28] sm:$0x7f]  ;;  %v335_v10 = vld [vmem:[%s655_s18 + $0x19] sm:$0xff]  ;;  %504 = vst.msk [vmem:[%s660_s21 + $0x2f] sm:$0x1] %vm503_vm0, %v623_v16  ;;  %v237_v36 = vshrl.u32 %v236_v33, 7 }
  0x1a   : > { %v332_v8 = vld [vmem:[%s655_s18 + $0x1] sm:$0xff]  ;;  %v337_v11 = vld [vmem:[%s655_s18 + $0x29] sm:$0x7f]  ;;  %v721_v16 = vld [vmem:[%s775_s2] ss:$0 sm:$0xff]  ;;  %vm501_vm4 = vcmask 522240  }
  0x1b   : > { %v333_v13 = vld [vmem:[%s655_s18 + $0x9] sm:$0xff]  ;;  %v336_v14 = vld [vmem:[%s655_s18 + $0x21] sm:$0xff]  ;;  %v278_v39 = vsub.s32 1, %v237_v36  ;;  %v238_v40 = vsub.s32 0, %v237_v36  ;;  %v318_v41 = vsub.s32 2, %v237_v36  ;;  %v370_v51 = vsub.s32 3, %v237_v36 }
  0x1c   : > { %v199_v43 = vld [vmem:[#allocation2] sm:$0x3f]  ;;  %v450_v55 = vsub.s32 5, %v237_v36  ;;  %v410_v58 = vsub.s32 4, %v237_v36 }
  0x1d   : > { %223 = vperm.xlu1 %602, %v203_v4   ;;  %213 = vperm.xlu0 %601, %v201_v5   ;;  %v279_v44 = vrot.slane %v199_v43, %v278_v39  ;;  %v694_v46 = vrot.slane %v199_v43, %v238_v40  ;;  %v696_v48 = vrot.slane %v199_v43, %v318_v41 }
  0x1e   : > { %v702_v57 = vrot.slane %v199_v43, %v370_v51  ;;  %v706_v61 = vrot.slane %v199_v43, %v450_v55 }
  0x21   : > { %233 = vperm.xlu1 %602, %v205_v6   ;;  %228 = vperm.xlu0 %601, %v204_v7  }
  0x25   : > { %603 = vset.pattern.permute.xlu1 %v621_v9  ;;  %340 = vperm.xlu0 %601, %v332_v8  }
  0x26   : > { %257 = vperm.xlu1 %603, %v201_v5  }
  0x29   : > { %355 = vperm.xlu0 %601, %v335_v10  }
  0x2a   : > { %261 = vperm.xlu1 %603, %v202_v1  }
  0x2d   : > { %365 = vperm.xlu0 %601, %v337_v11  }
  0x2e   : > { %269 = vperm.xlu1 %603, %v204_v7  }
  0x31   : > { %606 = vset.pattern.permute.xlu0 %v621_v9 }
  0x32   : > { %604 = vset.pattern.permute.xlu1 %v622_v12  ;;  %253 = vperm.xlu0 %606, %v200_v2  }
  0x33   : > { %293 = vperm.xlu1 %604, %v200_v2  }
  0x36   : > { %265 = vperm.xlu0 %606, %v203_v4  }
  0x37   : > { %301 = vperm.xlu1 %604, %v202_v1   ;;  %v709_v1 = vrot.slane %v199_v43, %v410_v58 }
  0x3a   : > { %273 = vperm.xlu0 %606, %v205_v6  }
  0x3b   : > { %305 = vperm.xlu1 %604, %v203_v4  }
  0x3e   : > { %389 = vperm.xlu0 %606, %v333_v13  }
  0x3f   : > { %313 = vperm.xlu1 %604, %v205_v6  }
  0x42   : > { %401 = vperm.xlu0 %606, %v336_v14  }
  0x43   : > { %605 = vset.pattern.permute.xlu1 %v620_v3 }
  0x44   : > { %345 = vperm.xlu1 %605, %v333_v13  }
  0x46   : > { %608 = vset.pattern.permute.xlu0 %v622_v12 }
  0x47   : > { %297 = vperm.xlu0 %608, %v201_v5  }
  0x48   : > { %350 = vperm.xlu1 %605, %v334_v15  }
  0x4b   : > { %309 = vperm.xlu0 %608, %v204_v7  }
  0x4c   : > { %360 = vperm.xlu1 %605, %v336_v14  }
  0x4f   : > { %425 = vperm.xlu0 %608, %v332_v8  }
  0x50   : > { %607 = vset.pattern.permute.xlu1 %v621_v9 }
  0x51   : > { %385 = vperm.xlu1 %607, %v332_v8  }
  0x53   : > { %437 = vperm.xlu0 %608, %v335_v10  }
  0x55   : > { %393 = vperm.xlu1 %607, %v334_v15  }
  0x57   : > { %445 = vperm.xlu0 %608, %v337_v11  }
  0x59   : > { %397 = vperm.xlu1 %607, %v335_v10  }
  0x5d   : > { %405 = vperm.xlu1 %607, %v337_v11  }
  0x61   : > { %609 = vset.pattern.permute.xlu1 %v622_v12 }
  0x62   : > { %429 = vperm.xlu1 %609, %v333_v13  }
  0x66   : > { %433 = vperm.xlu1 %609, %v334_v15  }
  0x6a   : > { %441 = vperm.xlu1 %609, %v336_v14  }
  0x98   : > { %v678_v17 = vpop.permute.xlu1 %218  ;;  %v209_v18 = vpop.permute.xlu0 %208 }
  0x99   : > { %v240_v50 = vmul.f32 %v694_v46, %v209_v18 }
  0x9c   : > { %v224_v19 = vpop.permute.xlu1 %223  ;;  %v214_v20 = vpop.permute.xlu0 %213 }
  0x9d   : > { %v243_v2 = vmul.f32 %v694_v46, %v224_v19  ;;  %v241_v10 = vmul.f32 %v694_v46, %v214_v20 }
  0xa0   : > { %v234_v21 = vpop.permute.xlu1 %233  ;;  %v680_v22 = vpop.permute.xlu0 %228 }
  0xa1   : > { %v245_v12 = vmul.f32 %v694_v46, %v234_v21  ;;  %v244_v58 = vmul.f32 %v694_v46, %v680_v22 }
  0xa4   : > { %v341_v23 = vpop.permute.xlu0 %340 }
  0xa5   : > { %v258_v24 = vpop.permute.xlu1 %257  ;;  %v372_v0 = vmul.f32 %v702_v57, %v341_v23 }
  0xa6   : > { %v281_v13 = vmul.f32 %v279_v44, %v258_v24 }
  0xa8   : > { %v356_v25 = vpop.permute.xlu0 %355  ;;  %v287_v21 = vadd.f32 %v281_v13, %v241_v10 }
  0xa9   : > { %v682_v26 = vpop.permute.xlu1 %261  ;;  %v375_v23 = vmul.f32 %v702_v57, %v356_v25 }
  0xaa   : > { %v282_v25 = vmul.f32 %v279_v44, %v682_v26 }
  0xac   : > { %v684_v27 = vpop.permute.xlu0 %365 }
  0xad   : > { %v686_v28 = vpop.permute.xlu1 %269  ;;  %v377_v40 = vmul.f32 %v702_v57, %v684_v27 }
  0xb1   : > { %v254_v29 = vpop.permute.xlu0 %253 }
  0xb2   : > { %v294_v30 = vpop.permute.xlu1 %293  ;;  %v280_v47 = vmul.f32 %v279_v44, %v254_v29 }
  0xb3   : > { %v320_v54 = vmul.f32 %v696_v48, %v294_v30 }
  0xb4   : > { %v286_v53 = vadd.f32 %v280_v47, %v240_v50  ;;  %v242_v47 = vmul.f32 %v694_v46, %v678_v17 }
  0xb5   : > { %v266_v31 = vpop.permute.xlu0 %265 }
  0xb6   : > { %v688_v32 = vpop.permute.xlu1 %301  ;;  %v326_v60 = vadd.f32 %v320_v54, %v286_v53  ;;  %v283_v62 = vmul.f32 %v279_v44, %v266_v31 }
  0xb7   : > { %v322_v50 = vmul.f32 %v696_v48, %v688_v32 }
  0xb8   : > { %v378_v5 = vadd.f32 %v372_v0, %v326_v60  ;;  %v289_v8 = vadd.f32 %v283_v62, %v243_v2  ;;  %v288_v60 = vadd.f32 %v282_v25, %v242_v47 }
  0xb9   : > { %v274_v34 = vpop.permute.xlu0 %273 }
  0xba   : > { %v306_v35 = vpop.permute.xlu1 %305  ;;  %v285_v9 = vmul.f32 %v279_v44, %v274_v34 }
  0xbb   : > { %v323_v3 = vmul.f32 %v696_v48, %v306_v35 }
  0xbc   : > { %v291_v29 = vadd.f32 %v285_v9, %v245_v12 }
  0xbd   : > { %v690_v37 = vpop.permute.xlu0 %389  ;;  %v329_v14 = vadd.f32 %v323_v3, %v289_v8 }
  0xbe   : > { %v314_v38 = vpop.permute.xlu1 %313  ;;  %v413_v0 = vmul.f32 %v709_v1, %v690_v37 }
  0xbf   : > { %v325_v15 = vmul.f32 %v696_v48, %v314_v38  ;;  %v381_v34 = vadd.f32 %v375_v23, %v329_v14 }
  0xc1   : > { %v692_v42 = vpop.permute.xlu0 %401  ;;  %v331_v24 = vadd.f32 %v325_v15, %v291_v29 }
  0xc2   : > { %v416_v14 = vmul.f32 %v709_v1, %v692_v42 }
  0xc3   : > { %v346_v45 = vpop.permute.xlu1 %345  ;;  %v383_v55 = vadd.f32 %v377_v40, %v331_v24 }
  0xc4   : > { %v373_v51 = vmul.f32 %v702_v57, %v346_v45 }
  0xc6   : > { %v298_v49 = vpop.permute.xlu0 %297 }
  0xc7   : > { %v699_v52 = vpop.permute.xlu1 %350  ;;  %v321_v30 = vmul.f32 %v696_v48, %v298_v49  ;;  %v284_v49 = vmul.f32 %v279_v44, %v686_v28 }
  0xc8   : > { %v374_v2 = vmul.f32 %v702_v57, %v699_v52 }
  0xc9   : > { %v327_v39 = vadd.f32 %v321_v30, %v287_v21  ;;  %v290_v62 = vadd.f32 %v284_v49, %v244_v58 }
  0xca   : > { %v310_v56 = vpop.permute.xlu0 %309 }
  0xcb   : > { %v704_v59 = vpop.permute.xlu1 %360  ;;  %v379_v17 = vadd.f32 %v373_v51, %v327_v39  ;;  %v324_v28 = vmul.f32 %v696_v48, %v310_v56 }
  0xcc   : > { %v376_v22 = vmul.f32 %v702_v57, %v704_v59 }
  0xcd   : > { %v330_v3 = vadd.f32 %v324_v28, %v290_v62 }
  0xce   : > { %v426_v63 = vpop.permute.xlu0 %425 }
  0xcf   : > { %v452_v7 = vmul.f32 %v706_v61, %v426_v63  ;;  %v328_v63 = vadd.f32 %v322_v50, %v288_v60  ;;  %v382_v9 = vadd.f32 %v376_v22, %v330_v3 }
  0xd0   : > { %v386_v4 = vpop.permute.xlu1 %385 }
  0xd1   : > { %v412_v6 = vmul.f32 %v709_v1, %v386_v4  ;;  %v380_v8 = vadd.f32 %v374_v2, %v328_v63  ;;  %v422_v30 = vadd.f32 %v416_v14, %v382_v9 }
  0xd2   : > { %v438_v20 = vpop.permute.xlu0 %437 }
  0xd3   : > { %v418_v11 = vadd.f32 %v412_v6, %v378_v5  ;;  %v455_v36 = vmul.f32 %v706_v61, %v438_v20  ;;  %v419_v5 = vadd.f32 %v413_v0, %v379_v17 }
  0xd4   : > { %v394_v18 = vpop.permute.xlu1 %393 }
  0xd5   : > { %v458_v19 = vadd.f32 %v452_v7, %v418_v11  ;;  %v414_v4 = vmul.f32 %v709_v1, %v394_v18 }
  0xd6   : > { %v446_v53 = vpop.permute.xlu0 %445 }
  0xd7   : > { %v471_v31 = vadd.f32 %v721_v16, %v458_v19  ;;  %v457_v32 = vmul.f32 %v706_v61, %v446_v53  ;;  %v420_v10 = vadd.f32 %v414_v4, %v380_v8 }
  0xd8   : > { %v398_v33 = vpop.permute.xlu1 %397 }
  0xd9   : > { %vm477_vm2 = vcmp.ge.f32.partialorder %v471_v31, 0.0  ;;  %v483_v35 = vmul.f32 0.1, %v471_v31  ;;  %v415_v38 = vmul.f32 %v709_v1, %v398_v33 }
  0xdb   : > { %v489_v41 = vsel %vm477_vm2, %v471_v31, %v483_v35  ;;  %v421_v43 = vadd.f32 %v415_v38, %v381_v34 }
  0xdc   : > { %496 = vst.msk [vmem:[%s660_s21] sm:$0xff] %vm495_vm1, %v489_v41  ;;  %v406_v26 = vpop.permute.xlu1 %405 }
  0xdd   : > { %v461_v54 = vadd.f32 %v455_v36, %v421_v43  ;;  %v417_v27 = vmul.f32 %v709_v1, %v406_v26 }
  0xdf   : > { %v474_v44 = vadd.f32 %v721_v16, %v461_v54  ;;  %v423_v45 = vadd.f32 %v417_v27, %v383_v55 }
  0xe1   : > { %vm480_vm3 = vcmp.ge.f32.partialorder %v474_v44, 0.0  ;;  %v486_v46 = vmul.f32 0.1, %v474_v44  ;;  %v463_v48 = vadd.f32 %v457_v32, %v423_v45  ;;  %v430_v56 = vpop.permute.xlu1 %429 }
  0xe2   : > { %v453_v6 = vmul.f32 %v706_v61, %v430_v56 }
  0xe3   : > { %v492_v7 = vsel %vm480_vm3, %v474_v44, %v486_v46  ;;  %v476_v37 = vadd.f32 %v721_v16, %v463_v48 }
  0xe4   : > { %499 = vst.msk [vmem:[%s660_s21 + $0x18] sm:$0xff] %vm495_vm1, %v492_v7  ;;  %v459_v52 = vadd.f32 %v453_v6, %v419_v5 }
  0xe5   : > { %vm482_vm5 = vcmp.ge.f32.partialorder %v476_v37, 0.0  ;;  %v488_v57 = vmul.f32 0.1, %v476_v37  ;;  %v434_v59 = vpop.permute.xlu1 %433 }
  0xe6   : > { %v472_v11 = vadd.f32 %v721_v16, %v459_v52  ;;  %v454_v12 = vmul.f32 %v706_v61, %v434_v59 }
  0xe7   : > { %v494_v13 = vsel %vm482_vm5, %v476_v37, %v488_v57 }
  0xe8   : > { %502 = vst.msk [vmem:[%s660_s21 + $0x28] sm:$0x7f] %vm501_vm4, %v494_v13  ;;  %vm478_vm6 = vcmp.ge.f32.partialorder %v472_v11, 0.0  ;;  %v484_v15 = vmul.f32 0.1, %v472_v11  ;;  %v460_v18 = vadd.f32 %v454_v12, %v420_v10 }
  0xe9   : > { %v442_v19 = vpop.permute.xlu1 %441 }
  0xea   : > { %v490_v23 = vsel %vm478_vm6, %v472_v11, %v484_v15  ;;  %v473_v29 = vadd.f32 %v721_v16, %v460_v18  ;;  %v456_v20 = vmul.f32 %v706_v61, %v442_v19 }
  0xeb   : > { %497 = vst.msk [vmem:[%s660_s21 + $0x8] sm:$0xff] %vm495_vm1, %v490_v23 }
  0xec   : > { %vm479_vm7 = vcmp.ge.f32.partialorder %v473_v29, 0.0  ;;  %v485_v31 = vmul.f32 0.1, %v473_v29  ;;  %v462_v21 = vadd.f32 %v456_v20, %v422_v30 }
  0xee   : > { %v491_v24 = vsel %vm479_vm7, %v473_v29, %v485_v31  ;;  %v475_v42 = vadd.f32 %v721_v16, %v462_v21 }
  0xef   : > { %498 = vst.msk [vmem:[%s660_s21 + $0x10] sm:$0xff] %vm495_vm1, %v491_v24 }
  0xf0   : > { %vm481_vm8 = vcmp.ge.f32.partialorder %v475_v42, 0.0  ;;  %v487_v1 = vmul.f32 0.1, %v475_v42 }
  0xf2   : > { %v493_v33 = vsel %vm481_vm8, %v475_v42, %v487_v1 }
  0xf3   : > { %500 = vst.msk [vmem:[%s660_s21 + $0x20] sm:$0xff] %vm495_vm1, %v493_v33 }
  0xf4 PF: > { %s13_s12 = sadd.s32 1, %s618_s12  }
  0xf5   : > { %p10_p5 = scmp.ge.s32.totalorder %s13_s12, 5  }
  0xf7   :  { %12 = sbr.rel (!%p10_p5) target bundleno = 1 (0x1), region = 102 }
  0xfe   :  { %527 = vsyncmov [#allocation3] }
 0x101   :  { %s528_s26 = vpop.sfrf %527 }
 0x102   :  { %p588_p6 = scmp.ne.s32.totalorder %s528_s26, 0 }
 0x104   :  { %532 = shalt.err (%p588_p6)  }

</bundles_post_ra>
